<compile_context>
chip_gen: v7x
topology: tpu7x:2x2x1
jax: 0.10.0
libtpu: 0.0.40
codegen_flags: <defaults>
</compile_context>

<pallas_src>
import jax
import jax.numpy as jnp
from jax.experimental import pallas as pl
from jax.experimental.pallas import tpu as pltpu


# --------------------------------------------------------------------------
# Packed-parameter slab layout (144 rows x 128 lanes, f32, 8-row aligned):
#   rows   0..7   : W1aug   rows 0..3 = W1 (in,out), row 4 = b1, rows 5..7 = 0
#                   (x is padded to K=8 with a 1.0 in column 4 -> bias via MXU)
#   rows   8..135 : W_heads (128, 128)
#                     col 0 = Wa[:,0] - Wa[:,1]   (logit diff  s0 - s1)
#                     col 1 = Wa[:,1] - Wa[:,0]   (logit diff  s1 - s0)
#                     col 2 = Wv                  (value head)
#                     cols 3..127 = 0
#   row    136    : b_heads lane0 = ba0-ba1, lane1 = ba1-ba0, lane2 = bv
#   rows 137..143 : zero padding
# --------------------------------------------------------------------------
PARAM_ROWS = 144
_W1_ROW = 0       # 8 rows
_WH_ROW = 8       # 128 rows
_BH_ROW = 136     # 1 row


def policy_kernel(x_ref, p_ref, out_ref):
    x = x_ref[...]                                              # (TB, 8): obs|1|0

    # ---- Layer 1: h = relu([x,1,0..] @ [W1;b1;0..])  (bias folded into MXU) --
    w1 = p_ref[pl.ds(_W1_ROW, 8), :]                            # (8, 128)
    h = jnp.maximum(
        jnp.dot(x, w1, preferred_element_type=jnp.float32), 0.0)   # (TB, 128)

    # ---- Fused heads: one (128,128) matmul for both action + value ----------
    wh = p_ref[pl.ds(_WH_ROW, 128), :]                          # (128, 128)
    bh = p_ref[pl.ds(_BH_ROW, 1), :]                            # (1, 128)
    z = jnp.dot(h, wh, preferred_element_type=jnp.float32) + bh     # (TB, 128)
    # z lanes: 0 = s0 - s1, 1 = s1 - s0, 2 = state value, 3..127 = 0.

    # ---- 2-way softmax as elementwise sigmoid of the logit differences ------
    # softmax([s0,s1]) == [sigmoid(s0-s1), sigmoid(s1-s0)]: pure VPU/EUP work,
    # no cross-lane reduce, no -inf masking, exact divide.
    z8 = z[:, 0:8]                                              # (TB, 8)
    lane = jax.lax.broadcasted_iota(jnp.int32, z8.shape, 1)
    probs = 1.0 / (1.0 + jnp.exp(-z8))

    # Output lanes: 0-1 = probs, 2 = value, 3..7 = 0.
    out_ref[...] = jnp.where(lane < 2, probs, jnp.where(lane == 2, z8, 0.0))


def pack_params(w1, b1, wa, ba, wv, bv):
    """Pack all Policy parameters into one (144, 128) f32 slab (call once).

    w1: (4,128)  b1: (1,128)  wa: (128,2)  ba: (...,2)  wv: (128,1)  bv: (...,1)
    (weights stored (in, out), i.e. already transposed vs. nn.Linear.weight)
    """
    w1 = jnp.asarray(w1, jnp.float32).reshape(4, 128)
    b1 = jnp.asarray(b1, jnp.float32).reshape(128)
    wa = jnp.asarray(wa, jnp.float32).reshape(128, 2)
    ba = jnp.asarray(ba, jnp.float32).reshape(2)
    wv = jnp.asarray(wv, jnp.float32).reshape(128, 1)
    bv = jnp.asarray(bv, jnp.float32).reshape(1)

    slab = jnp.zeros((PARAM_ROWS, 128), jnp.float32)
    # Layer-1 block (K padded to 8, bias as row 4).
    slab = slab.at[0:4, :].set(w1)
    slab = slab.at[4, :].set(b1)
    # Fused head block: logit-difference columns + value column.
    wh = jnp.zeros((128, 128), jnp.float32)
    wh = wh.at[:, 0].set(wa[:, 0] - wa[:, 1])
    wh = wh.at[:, 1].set(wa[:, 1] - wa[:, 0])
    wh = wh.at[:, 2].set(wv[:, 0])
    slab = slab.at[_WH_ROW:_WH_ROW + 128, :].set(wh)
    bh = jnp.zeros((128,), jnp.float32)
    bh = bh.at[0].set(ba[0] - ba[1]).at[1].set(ba[1] - ba[0]).at[2].set(bv[0])
    slab = slab.at[_BH_ROW, :].set(bh)
    assert slab.shape == (PARAM_ROWS, 128)
    return slab


def _round_up(n, m):
    return ((n + m - 1) // m) * m


def policy_forward(x, params, *, max_batch_tile=256):
    """x: (B, 4) f32 observations. params: packed (144, 128) slab.

    Returns (probs (B,2), values (B,1)).
    """
    B = x.shape[0]
    # Pick the batch tile: whole (8-padded) batch if small, else 256-row tiles
    # (multiple of the v6e/v7x 256-wide MXU) sharded across cores.
    Bp = _round_up(max(B, 8), 8)
    if Bp <= max_batch_tile:
        tb = Bp
    else:
        tb = max_batch_tile
        Bp = _round_up(Bp, tb)
    grid = (Bp // tb,)

    # Host-side pad: columns 0..3 = obs, column 4 = 1.0 (layer-1 bias hook),
    # columns 5..7 = 0; extra rows are zero and sliced off below.
    xp = jnp.zeros((Bp, 8), jnp.float32)
    xp = xp.at[:B, 0:4].set(x.astype(jnp.float32))
    xp = xp.at[:B, 4].set(1.0)

    out = pl.pallas_call(
        policy_kernel,
        out_shape=jax.ShapeDtypeStruct((Bp, 8), jnp.float32),
        grid=grid,
        in_specs=[
            pl.BlockSpec((tb, 8), lambda i: (i, 0)),
            # Constant index_map -> slab fetched once, VMEM-resident across steps.
            pl.BlockSpec((PARAM_ROWS, 128), lambda i: (0, 0)),
        ],
        out_specs=pl.BlockSpec((tb, 8), lambda i: (i, 0)),
        compiler_params=pltpu.CompilerParams(
            dimension_semantics=("parallel",)),
        cost_estimate=pl.CostEstimate(
            flops=2 * Bp * 8 * 128 + 2 * Bp * 128 * 128,
            transcendentals=Bp * 8,
            bytes_accessed=(Bp * 8 + PARAM_ROWS * 128 + Bp * 8) * 4,
        ),
    )(xp, params)

    probs = out[:B, 0:2]                                        # (B, 2)
    values = out[:B, 2:3]                                       # (B, 1)
    return probs, values


def init_params(key):
    """Deterministic init mimicking nn.Linear's U(-1/sqrt(fan_in), 1/sqrt(fan_in))."""
    ks = jax.random.split(key, 6)

    def linear(kw, kb, fan_in, fan_out):
        bound = 1.0 / jnp.sqrt(fan_in)
        w = jax.random.uniform(kw, (fan_in, fan_out), jnp.float32, -bound, bound)
        b = jax.random.uniform(kb, (1, fan_out), jnp.float32, -bound, bound)
        return w, b

    w1, b1 = linear(ks[0], ks[1], 4, 128)
    wa, ba = linear(ks[2], ks[3], 128, 2)
    wv, bv = linear(ks[4], ks[5], 128, 1)
    return w1, b1, wa, ba, wv, bv


if __name__ == "__main__":
    key = jax.random.PRNGKey(0)
    k_x, k_p = jax.random.split(key)

    B = 8  # small batch of CartPole-like 4-dim observations
    x = jax.random.normal(k_x, (B, 4), jnp.float32)
    w1, b1, wa, ba, wv, bv = init_params(k_p)
    params = pack_params(w1, b1, wa, ba, wv, bv)   # pack once, reuse every call

    # jit the whole forward so the pad / kernel / slice fuse into one dispatch
    # (per-call launch overhead dominates at this size).
    fwd = jax.jit(policy_forward)
    probs, values = fwd(x, params)
    jax.block_until_ready((probs, values))

    # Pure-JAX reference check.
    h_ref = jnp.maximum(x @ w1 + b1, 0.0)
    probs_ref = jax.nn.softmax(h_ref @ wa + ba, axis=-1)
    values_ref = h_ref @ wv + bv
    assert probs.shape == (B, 2) and values.shape == (B, 1)
    assert jnp.allclose(probs, probs_ref, atol=3e-3)
    assert jnp.allclose(values, values_ref, atol=5e-4)
    assert jnp.allclose(jnp.sum(probs, axis=-1), 1.0, atol=1e-5)

    print("KERNEL_OK")
</pallas_src>

<mosaic_0001>
module attributes {stable_mosaic.version = 11 : i64} {
  func.func @policy_kernel(%arg0: i32, %arg1: memref<8x8xf32, #tpu.memory_space<vmem>>, %arg2: memref<144x128xf32, #tpu.memory_space<vmem>>, %arg3: memref<8x8xf32, #tpu.memory_space<vmem>>) attributes {dimension_semantics = [#tpu.dimension_semantics<parallel>], iteration_bounds = array<i64: 1>, scalar_prefetch = 0 : i64, scratch_operands = 0 : i64, tpu.core_type = #tpu.core_type<tc>, window_params = [{transform_indices = @transform_0, window_bounds = array<i64: 8, 8>}, {pipeline_mode = #tpu.pipeline_mode<synchronous>, transform_indices = @transform_1, window_bounds = array<i64: 144, 128>}, {transform_indices = @transform_2, window_bounds = array<i64: 8, 8>}]} {
    %c0 = arith.constant 0 : index
    %c0_0 = arith.constant 0 : index
    %0 = vector.load %arg1[%c0, %c0_0] : memref<8x8xf32, #tpu.memory_space<vmem>>, vector<8x8xf32>
    %c0_1 = arith.constant 0 : index
    %c0_2 = arith.constant 0 : index
    %1 = vector.load %arg2[%c0_1, %c0_2] : memref<144x128xf32, #tpu.memory_space<vmem>>, vector<8x128xf32>
    %cst = arith.constant dense<0.000000e+00> : vector<8x128xf32>
    %2 = tpu.matmul %0, %1, %cst {dimension_numbers = #tpu.dot_dimension_numbers<[1], [0], [0], [1], [0, 0, 1, 1], [], []>} : vector<8x8xf32>, vector<8x128xf32>, vector<8x128xf32> -> vector<8x128xf32>
    %cst_3 = arith.constant 0.000000e+00 : f32
    %3 = vector.broadcast %cst_3 : f32 to vector<8x128xf32>
    %4 = arith.maximumf %2, %3 : vector<8x128xf32>
    %c8 = arith.constant 8 : index
    %c0_4 = arith.constant 0 : index
    %5 = vector.load %arg2[%c8, %c0_4] : memref<144x128xf32, #tpu.memory_space<vmem>>, vector<128x128xf32>
    %c136 = arith.constant 136 : index
    %c0_5 = arith.constant 0 : index
    %6 = vector.load %arg2[%c136, %c0_5] : memref<144x128xf32, #tpu.memory_space<vmem>>, vector<1x128xf32>
    %cst_6 = arith.constant dense<0.000000e+00> : vector<8x128xf32>
    %7 = tpu.matmul %4, %5, %cst_6 {dimension_numbers = #tpu.dot_dimension_numbers<[1], [0], [0], [1], [0, 0, 1, 1], [], []>} : vector<8x128xf32>, vector<128x128xf32>, vector<8x128xf32> -> vector<8x128xf32>
    %8 = vector.broadcast %6 : vector<1x128xf32> to vector<8x128xf32>
    %9 = arith.addf %7, %8 : vector<8x128xf32>
    %10 = vector.extract_strided_slice %9 {offsets = [0, 0], sizes = [8, 8], strides = [1, 1]} : vector<8x128xf32> to vector<8x8xf32>
    %11 = tpu.iota {dimensions = array<i32: 1>} : vector<8x8xi32>
    %cst_7 = arith.constant 0.000000e+00 : f32
    %12 = vector.broadcast %cst_7 : f32 to vector<8x8xf32>
    %13 = arith.subf %12, %10 : vector<8x8xf32>
    %14 = math.exp %13 : vector<8x8xf32>
    %cst_8 = arith.constant 1.000000e+00 : f32
    %15 = vector.broadcast %cst_8 : f32 to vector<8x8xf32>
    %16 = arith.addf %15, %14 : vector<8x8xf32>
    %cst_9 = arith.constant 1.000000e+00 : f32
    %17 = vector.broadcast %cst_9 : f32 to vector<8x8xf32>
    %18 = arith.divf %17, %16 : vector<8x8xf32>
    %c2_i32 = arith.constant 2 : i32
    %19 = vector.broadcast %c2_i32 : i32 to vector<8x8xi32>
    %20 = arith.cmpi slt, %11, %19 : vector<8x8xi32>
    %c2_i32_10 = arith.constant 2 : i32
    %21 = vector.broadcast %c2_i32_10 : i32 to vector<8x8xi32>
    %22 = arith.cmpi eq, %11, %21 : vector<8x8xi32>
    %cst_11 = arith.constant 0.000000e+00 : f32
    %23 = vector.broadcast %cst_11 : f32 to vector<8x8xf32>
    %24 = arith.select %22, %10, %23 : vector<8x8xi1>, vector<8x8xf32>
    %25 = arith.select %20, %18, %24 : vector<8x8xi1>, vector<8x8xf32>
    %c0_12 = arith.constant 0 : index
    %c0_13 = arith.constant 0 : index
    %26 = vector.load %arg3[%c0_12, %c0_13] : memref<8x8xf32, #tpu.memory_space<vmem>>, vector<8x8xf32>
    tpu.vector_store %arg3[%c0_12, %c0_13], %25 {strides = array<i32>} : memref<8x8xf32, #tpu.memory_space<vmem>>, vector<8x8xf32>,
    return
  }
  func.func @transform_0(%arg0: i32) -> (i32, i32) {
    %c0_i32 = arith.constant 0 : i32
    %c0_i32_0 = arith.constant 0 : i32
    return %arg0, %c0_i32 : i32, i32
  }
  func.func @transform_1(%arg0: i32) -> (i32, i32) {
    %c0_i32 = arith.constant 0 : i32
    %c0_i32_0 = arith.constant 0 : i32
    %c0_i32_1 = arith.constant 0 : i32
    return %c0_i32, %c0_i32_0 : i32, i32
  }
  func.func @transform_2(%arg0: i32) -> (i32, i32) {
    %c0_i32 = arith.constant 0 : i32
    %c0_i32_0 = arith.constant 0 : i32
    return %arg0, %c0_i32 : i32, i32
  }
}

</mosaic_0001>

<bundles_post_ra>
// kernel: policy_forward.1
= control target key start
LH: loop header
LB: loop body
LE: loop exit
PB: predicated region body
PF: predicated region fallthrough
CT: control target
= control target key end

     0   :  { %7 = vsyncpa [#allocation3], 0  ;;  %s330_s9 = smov [#allocation2]   ;;  %s371_s0 = inlined_call_operand.vmem [shape: f32[8,8], index: 0, kind: input, shape index: {}]   ;;  %s372_s1 = inlined_call_operand.hbm [shape: f32[144,128], index: 1, kind: input, shape index: {}]   ;;  %s373_s2 = inlined_call_operand.vmem [shape: f32[8,8], index: 2, kind: output, shape index: {}]  }
   0x1   :  { %s15_s10 = sshll.u32 %s330_s9, 4  ;;  %s306_s13 = scalar_lea.hbm %s372_s1, 2304  ;;  %s16_s10 = int_to_ptr.vmem [resolvable:$true] %s15_s10 }
   0x2   :  { %p307_p0 = scmp.ne.s32.totalorder %s372_s1, %s306_s13  ;;  %p310_p1 = scmp.lt.u32.totalorder %s306_s13, %s372_s1 }
   0x4   :  { %p312_p2 = pnand %p310_p1, %p307_p0 }
   0x6   :  { %315 = shalt.err (!%p312_p2)
}
   0x7   :  { %s316_s18 = scalar_lea.vmem %s16_s10, 2304  ;;  %p321_p4 = scmp.lt.s32.totalorder %s16_s10, %s16_s10 }
   0x8   :  { %p317_p3 = scmp.ne.s32.totalorder %s16_s10, %s316_s18  ;;  %p322_p5 = scmp.lt.s32.totalorder %s316_s18, %s316_s18 }
   0xa   :  { %p323_p6 = por %p322_p5, %p321_p4 }
   0xc   :  { %p324_p7 = pnand %p323_p6, %p317_p3 }
   0xe   :  { %327 = shalt.err (!%p324_p7)
}
   0xf   :  { %s331_s19 = smov 128   ;;  %s332_s20 = smov 8  }
  0x10   :  { %21 = dma.hbm_to_vmem [thread:$0]  %s372_s1, 2304, %s16_s10, [#allocation3], %s331_s19, %s331_s19, %s332_s20  }
  0x11   :  { %328 = dma.done.wait [#allocation3], 2304  }
  0x12   :  { %329 = vsyncadd [#allocation3], 4294964992  ;;  %v333_v0 = vmov 0.0   ;;  %vm334_vm0 = vmmov 0   ;;  %v335_v1 = vmov 0.0|0.0   ;;  %vm27_vm1 = vcmask 64512  }
  0x13   :  { %232 = vmatprep.subr.mxu0 %v333_v0  ;;  %234 = vmatprep.mubr.msk.f32.mxu0 %vm334_vm0, %v333_v0  ;;  %v26_v2 = vld [vmem:[#allocation2] sm:$0xff]  ;;  %v102_v4 = vld [vmem:[#allocation2 + $0x8] sm:$0xff]  ;;  %v103_v5 = vld [vmem:[#allocation2 + $0x10] sm:$0xff]  ;;  %v193_v39 = vlaneseq }
  0x14   :  { %272 = vmatprep.subr.bf16.mxu1 %v335_v1  ;;  %269 = vmatprep.mubr.msk.f32.mxu1 %vm334_vm0, %v333_v0  ;;  %v25_v3 = vld [vmem:[%s371_s0] sm:$0xff]  ;;  %v104_v6 = vld [vmem:[#allocation2 + $0x18] sm:$0xff]  ;;  %v273_v8 = vpack.c.bf16 %v103_v5, %v102_v4  ;;  %v106_v10 = vld [vmem:[#allocation2 + $0x28] sm:$0xff] }
  0x15   :  { %233 = vmatpush3.msra.mxu0 %v26_v2  ;;  %v105_v7 = vld [vmem:[#allocation2 + $0x20] sm:$0xff]  ;;  %v107_v11 = vld [vmem:[#allocation2 + $0x30] sm:$0xff]  ;;  %v108_v13 = vld [vmem:[#allocation2 + $0x38] sm:$0xff]  ;;  %v194_v40 = vand.u32 127, %v193_v39 }
  0x16   :  { %235 = vmatmul.mubr.msk.f32.vlgmr.msra.gmra.mrb[0].mxu0 %vm27_vm1, %v25_v3  ;;  %274 = vmatpush3.bf16.msra.mxu1 %v273_v8  ;;  %v276_v9 = vpack.c.bf16 %v105_v7, %v104_v6  ;;  %v279_v12 = vpack.c.bf16 %v107_v11, %v106_v10  ;;  %v109_v14 = vld [vmem:[#allocation2 + $0x40] sm:$0xff]  ;;  %v110_v16 = vld [vmem:[#allocation2 + $0x48] sm:$0xff]  ;;  %v111_v17 = vld [vmem:[#allocation2 + $0x50] sm:$0xff] }
  0x17   :  { %275 = vmatprep.subr.bf16.mxu1 %v335_v1  ;;  %v282_v15 = vpack.c.bf16 %v109_v14, %v108_v13  ;;  %v285_v18 = vpack.c.bf16 %v111_v17, %v110_v16  ;;  %v112_v19 = vld [vmem:[#allocation2 + $0x58] sm:$0xff]  ;;  %v113_v20 = vld [vmem:[#allocation2 + $0x60] sm:$0xff]  ;;  %v114_v22 = vld [vmem:[#allocation2 + $0x68] sm:$0xff]  ;;  %vm202_vm2 = vcmp.eq.s32.totalorder %v194_v40, 2  ;;  %vm201_vm3 = vcmp.lt.s32.totalorder %v194_v40, 2 }
  0x18   :  { %v288_v21 = vpack.c.bf16 %v113_v20, %v112_v19  ;;  %v115_v23 = vld [vmem:[#allocation2 + $0x70] sm:$0xff]  ;;  %v116_v25 = vld [vmem:[#allocation2 + $0x78] sm:$0xff]  ;;  %v117_v26 = vld [vmem:[#allocation2 + $0x80] sm:$0xff] }
  0x19   :  { %v291_v24 = vpack.c.bf16 %v115_v23, %v114_v22  ;;  %v294_v27 = vpack.c.bf16 %v117_v26, %v116_v25  ;;  %v212_v31 = vld [vmem:[#allocation2 + $0x88] ss:$0 sm:$0xff] }
  0x1a   :  { %277 = vmatpush3.bf16.msra.mxu1 %v276_v9 }
  0x1b   :  { %278 = vmatprep.subr.bf16.mxu1 %v335_v1 }
  0x1e   :  { %280 = vmatpush3.bf16.msra.mxu1 %v279_v12 }
  0x1f   :  { %281 = vmatprep.subr.bf16.mxu1 %v335_v1 }
  0x22   :  { %283 = vmatpush3.bf16.msra.mxu1 %v282_v15 }
  0x23   :  { %284 = vmatprep.subr.bf16.mxu1 %v335_v1 }
  0x26   :  { %286 = vmatpush3.bf16.msra.mxu1 %v285_v18 }
  0x27   :  { %287 = vmatprep.subr.bf16.mxu1 %v335_v1 }
  0x2a   :  { %289 = vmatpush3.bf16.msra.mxu1 %v288_v21 }
  0x2b   :  { %290 = vmatprep.subr.bf16.mxu1 %v335_v1 }
  0x2e   :  { %292 = vmatpush3.bf16.msra.mxu1 %v291_v24 }
  0x2f   :  { %293 = vmatprep.subr.bf16.mxu1 %v335_v1 }
  0x32   :  { %295 = vmatpush3.bf16.msra.mxu1 %v294_v27 }
  0xe9   :  { %v97_v28 = vpop.f32.mrb[0].mxu0 }
  0xea   :  { %v101_v29 = vmax.f32 %v97_v28, 0.0  ;;  %v236_v30 = vpop.f32.mrb[1].mxu0 }
  0xec   :  { %270 = vmatmul.mubr.f32.vlgmr.msra.gmra.mrb[0].mxu1 %v101_v29 }
 0x1bf   :  { %v189_v32 = vpop.f32.mrb[0].mxu1 }
 0x1c0   :  { %v190_v33 = vadd.f32 %v212_v31, %v189_v32  ;;  %v271_v34 = vpop.f32.mrb[1].mxu1 }
 0x1c2   :  { %v195_v35 = vsub.f32 0.0, %v190_v33  ;;  %v203_v42 = vsel %vm202_vm2, %v190_v33, 0.0 }
 0x1c4   :  { %v196_v36 = vmul.f32 1.442695, %v195_v35 }
 0x1c6   :  { %302 = vpow2.f32 %v196_v36 }
 0x1d0   :  { %v303_v37 = vpop.eup %302 }
 0x1d1   :  { %v198_v38 = vadd.f32 1.0, %v303_v37 }
 0x1d3   :  { %304 = vrcp.f32 %v198_v38 }
 0x1dd   :  { %v305_v41 = vpop.eup %304 }
 0x1de   :  { %v204_v43 = vsel %vm201_vm3, %v305_v41, %v203_v42 }
 0x1df   :  { %205 = vst.msk [vmem:[%s373_s2] sm:$0xff] %vm27_vm1, %v204_v43 }
 0x1e0   :  { %210 = vsyncpa [#allocation3], 1 }

</bundles_post_ra>
